<compile_context>
chip_gen: v5e
topology: v5e:2x2
jax: 0.10.0
libtpu: 0.0.40
codegen_flags: <defaults>
</compile_context>

<pallas_src>
import functools

import numpy as np
import jax
import jax.numpy as jnp
from jax.experimental import pallas as pl
from jax.experimental.pallas import tpu as pltpu


def _sobel_kernel(cl_ref, cr_ref, x_ref, o_ref, *, h, w):
    # cl_ref / cr_ref : (1, H*W) float32 column-validity masks (broadcast over TB)
    # x_ref / o_ref   : (TB, H*W) float32, one image per row, row-major (i*W + j)
    hw = h * w
    x = x_ref[...]
    cl = cl_ref[...]                  # 1.0 where column j <= W-2 (right neighbor exists)
    cr = cr_ref[...]                  # 1.0 where column j >= 1   (left  neighbor exists)

    # Column-shifted taps with zero padding at the left/right image borders.
    # roll(x, s)[f] = x[(f - s) mod HW]; the masks kill wrapped / cross-row
    # elements, so xr[f] == x[i, j+1] and xl[f] == x[i, j-1] (0 outside image).
    xr = pltpu.roll(x, shift=(hw - 1) % hw, axis=1) * cl
    xl = pltpu.roll(x, shift=1 % hw, axis=1) * cr

    d = xr - xl                       # horizontal [-1, 0, 1]
    m = xl + 2.0 * x + xr             # horizontal [ 1, 2, 1]

    # Row-shifted taps of D and M (shift by +-W along the fused axis); rows
    # that would wrap across the top/bottom image border are masked to zero.
    f = jax.lax.broadcasted_iota(jnp.int32, x.shape, 1)
    up_ok = f >= w                    # row i-1 exists
    dn_ok = f < hw - w                # row i+1 exists
    zero = jnp.zeros_like(x)

    d_up = jnp.where(up_ok, pltpu.roll(d, shift=w % hw, axis=1), zero)         # D[i-1, j]
    d_dn = jnp.where(dn_ok, pltpu.roll(d, shift=(hw - w) % hw, axis=1), zero)  # D[i+1, j]
    m_up = jnp.where(up_ok, pltpu.roll(m, shift=w % hw, axis=1), zero)         # M[i-1, j]
    m_dn = jnp.where(dn_ok, pltpu.roll(m, shift=(hw - w) % hw, axis=1), zero)  # M[i+1, j]

    gx = d_up + 2.0 * d + d_dn        # vertical [1, 2, 1] applied to D
    gy = m_up - m_dn                  # vertical [1, 0, -1] applied to M
    o_ref[...] = (jnp.abs(gx) + jnp.abs(gy)).astype(o_ref.dtype)


def sobelxy(x, *, block_bytes=512 * 1024):
    """x: (B, C, H, W) float32 -> (B, C, 1, H, W) float32 (matches PyTorch module)."""
    b, c, h, w = x.shape
    n = b * c
    hw = h * w
    xf = x.reshape(n, hw)             # metadata-only reshape (row-major)

    # Host-built column-validity masks: tiny, constant index_map -> DMA'd once
    # and kept VMEM-resident across grid steps.
    col = np.arange(hw, dtype=np.int32) % w
    cl = jnp.asarray((col <= w - 2).astype(np.float32).reshape(1, hw))
    cr = jnp.asarray((col >= 1).astype(np.float32).reshape(1, hw))

    # Batch TB images per grid step so each block is a multi-hundred-KiB,
    # lane-dense slab; TB must be a multiple of 8 (sublane tiling) or == n.
    bytes_per_image = hw * x.dtype.itemsize
    tb = min(n, max(8, block_bytes // max(1, bytes_per_image)))
    if tb < n:
        tb = max(8, (tb // 8) * 8)
    grid = (pl.cdiv(n, tb),)
    # TODO(synk): strip-tile H (with a 1-row halo) instead of whole-image rows
    # once a single image no longer fits comfortably in VMEM.

    out = pl.pallas_call(
        functools.partial(_sobel_kernel, h=h, w=w),
        out_shape=jax.ShapeDtypeStruct((n, hw), x.dtype),
        grid=grid,
        in_specs=[
            pl.BlockSpec((1, hw), lambda i: (0, 0)),    # cl (resident, fetched once)
            pl.BlockSpec((1, hw), lambda i: (0, 0)),    # cr (resident, fetched once)
            pl.BlockSpec((tb, hw), lambda i: (i, 0)),   # x
        ],
        out_specs=pl.BlockSpec((tb, hw), lambda i: (i, 0)),
        compiler_params=pltpu.CompilerParams(
            dimension_semantics=("parallel",),
            vmem_limit_bytes=32 * 1024 * 1024,
        ),
    )(cl, cr, xf)

    # PyTorch: stack over channels of (1,1,H,W) -> (1,C,1,H,W); cat over batch.
    return out.reshape(b, c, 1, h, w)


def _reference(x):
    """Pure-JAX reference (pad + shifted windows, no Pallas)."""
    b, c, h, w = x.shape
    xp = jnp.pad(x, ((0, 0), (0, 0), (1, 1), (1, 1)))

    def s(p, q):
        return xp[:, :, p:p + h, q:q + w]

    gx = (-s(0, 0) + s(0, 2) - 2.0 * s(1, 0) + 2.0 * s(1, 2)
          - s(2, 0) + s(2, 2))
    gy = (s(0, 0) + 2.0 * s(0, 1) + s(0, 2)
          - s(2, 0) - 2.0 * s(2, 1) - s(2, 2))
    return (jnp.abs(gx) + jnp.abs(gy)).reshape(b, c, 1, h, w)


if __name__ == "__main__":
    key = jax.random.PRNGKey(0)
    B, C, H, W = 2, 4, 16, 16
    x = jax.random.normal(key, (B, C, H, W), dtype=jnp.float32)

    y = sobelxy(x)
    jax.block_until_ready(y)

    y_ref = _reference(x)
    assert y.shape == (B, C, 1, H, W), y.shape
    assert jnp.allclose(y, y_ref, atol=1e-5, rtol=1e-5), "mismatch vs reference"

    print("KERNEL_OK")
</pallas_src>

<mosaic_0001>
module attributes {stable_mosaic.version = 11 : i64} {
  func.func @_sobel_kernel(%arg0: i32, %arg1: memref<1x256xf32, #tpu.memory_space<vmem>>, %arg2: memref<1x256xf32, #tpu.memory_space<vmem>>, %arg3: memref<8x256xf32, #tpu.memory_space<vmem>>, %arg4: memref<8x256xf32, #tpu.memory_space<vmem>>) attributes {dimension_semantics = [#tpu.dimension_semantics<parallel>], iteration_bounds = array<i64: 1>, scalar_prefetch = 0 : i64, scratch_operands = 0 : i64, tpu.core_type = #tpu.core_type<tc>, window_params = [{pipeline_mode = #tpu.pipeline_mode<synchronous>, transform_indices = @transform_0, window_bounds = array<i64: 1, 256>}, {pipeline_mode = #tpu.pipeline_mode<synchronous>, transform_indices = @transform_1, window_bounds = array<i64: 1, 256>}, {transform_indices = @transform_2, window_bounds = array<i64: 8, 256>}, {transform_indices = @transform_3, window_bounds = array<i64: 8, 256>}]} {
    %c0 = arith.constant 0 : index
    %c0_0 = arith.constant 0 : index
    %0 = vector.load %arg3[%c0, %c0_0] : memref<8x256xf32, #tpu.memory_space<vmem>>, vector<8x256xf32>
    %c0_1 = arith.constant 0 : index
    %c0_2 = arith.constant 0 : index
    %1 = vector.load %arg1[%c0_1, %c0_2] : memref<1x256xf32, #tpu.memory_space<vmem>>, vector<1x256xf32>
    %c0_3 = arith.constant 0 : index
    %c0_4 = arith.constant 0 : index
    %2 = vector.load %arg2[%c0_3, %c0_4] : memref<1x256xf32, #tpu.memory_space<vmem>>, vector<1x256xf32>
    %c255_i32 = arith.constant 255 : i32
    %3 = tpu.dynamic_rotate %0 by %c255_i32 dim 1 : vector<8x256xf32>, i32 -> vector<8x256xf32>
    %4 = vector.broadcast %1 : vector<1x256xf32> to vector<8x256xf32>
    %5 = arith.mulf %3, %4 : vector<8x256xf32>
    %c1_i32 = arith.constant 1 : i32
    %6 = tpu.dynamic_rotate %0 by %c1_i32 dim 1 : vector<8x256xf32>, i32 -> vector<8x256xf32>
    %7 = vector.broadcast %2 : vector<1x256xf32> to vector<8x256xf32>
    %8 = arith.mulf %6, %7 : vector<8x256xf32>
    %9 = arith.subf %5, %8 : vector<8x256xf32>
    %cst = arith.constant 2.000000e+00 : f32
    %10 = vector.broadcast %cst : f32 to vector<8x256xf32>
    %11 = arith.mulf %10, %0 : vector<8x256xf32>
    %12 = arith.addf %8, %11 : vector<8x256xf32>
    %13 = arith.addf %12, %5 : vector<8x256xf32>
    %14 = tpu.iota {dimensions = array<i32: 1>} : vector<8x256xi32>
    %c16_i32 = arith.constant 16 : i32
    %15 = vector.broadcast %c16_i32 : i32 to vector<8x256xi32>
    %16 = arith.cmpi sge, %14, %15 : vector<8x256xi32>
    %c240_i32 = arith.constant 240 : i32
    %17 = vector.broadcast %c240_i32 : i32 to vector<8x256xi32>
    %18 = arith.cmpi slt, %14, %17 : vector<8x256xi32>
    %cst_5 = arith.constant 0.000000e+00 : f32
    %19 = vector.broadcast %cst_5 : f32 to vector<8x256xf32>
    %c16_i32_6 = arith.constant 16 : i32
    %20 = tpu.dynamic_rotate %9 by %c16_i32_6 dim 1 : vector<8x256xf32>, i32 -> vector<8x256xf32>
    %21 = arith.select %16, %20, %19 : vector<8x256xi1>, vector<8x256xf32>
    %c240_i32_7 = arith.constant 240 : i32
    %22 = tpu.dynamic_rotate %9 by %c240_i32_7 dim 1 : vector<8x256xf32>, i32 -> vector<8x256xf32>
    %23 = arith.select %18, %22, %19 : vector<8x256xi1>, vector<8x256xf32>
    %c16_i32_8 = arith.constant 16 : i32
    %24 = tpu.dynamic_rotate %13 by %c16_i32_8 dim 1 : vector<8x256xf32>, i32 -> vector<8x256xf32>
    %25 = arith.select %16, %24, %19 : vector<8x256xi1>, vector<8x256xf32>
    %c240_i32_9 = arith.constant 240 : i32
    %26 = tpu.dynamic_rotate %13 by %c240_i32_9 dim 1 : vector<8x256xf32>, i32 -> vector<8x256xf32>
    %27 = arith.select %18, %26, %19 : vector<8x256xi1>, vector<8x256xf32>
    %cst_10 = arith.constant 2.000000e+00 : f32
    %28 = vector.broadcast %cst_10 : f32 to vector<8x256xf32>
    %29 = arith.mulf %28, %9 : vector<8x256xf32>
    %30 = arith.addf %21, %29 : vector<8x256xf32>
    %31 = arith.addf %30, %23 : vector<8x256xf32>
    %32 = arith.subf %25, %27 : vector<8x256xf32>
    %33 = math.absf %31 : vector<8x256xf32>
    %34 = math.absf %32 : vector<8x256xf32>
    %35 = arith.addf %33, %34 : vector<8x256xf32>
    %c0_11 = arith.constant 0 : index
    %c0_12 = arith.constant 0 : index
    %36 = vector.load %arg4[%c0_11, %c0_12] : memref<8x256xf32, #tpu.memory_space<vmem>>, vector<8x256xf32>
    tpu.vector_store %arg4[%c0_11, %c0_12], %35 {strides = array<i32>} : memref<8x256xf32, #tpu.memory_space<vmem>>, vector<8x256xf32>,
    return
  }
  func.func @transform_0(%arg0: i32) -> (i32, i32) {
    %c0_i32 = arith.constant 0 : i32
    %c0_i32_0 = arith.constant 0 : i32
    %c0_i32_1 = arith.constant 0 : i32
    return %c0_i32, %c0_i32_0 : i32, i32
  }
  func.func @transform_1(%arg0: i32) -> (i32, i32) {
    %c0_i32 = arith.constant 0 : i32
    %c0_i32_0 = arith.constant 0 : i32
    %c0_i32_1 = arith.constant 0 : i32
    return %c0_i32, %c0_i32_0 : i32, i32
  }
  func.func @transform_2(%arg0: i32) -> (i32, i32) {
    %c0_i32 = arith.constant 0 : i32
    %c0_i32_0 = arith.constant 0 : i32
    return %arg0, %c0_i32 : i32, i32
  }
  func.func @transform_3(%arg0: i32) -> (i32, i32) {
    %c0_i32 = arith.constant 0 : i32
    %c0_i32_0 = arith.constant 0 : i32
    return %arg0, %c0_i32 : i32, i32
  }
}

</mosaic_0001>

<bundles_post_ra>
// kernel: tpu_custom_call.1
= control target key start
LH: loop header
LB: loop body
LE: loop exit
PB: predicated region body
PF: predicated region fallthrough
CT: control target
= control target key end

     0   :  { %8 = vsyncpa [#allocation3], 0  ;;  %s351_s0 = inlined_call_operand.hbm [shape: f32[1,256], index: 0, kind: input, shape index: {}]   ;;  %s352_s1 = inlined_call_operand.hbm [shape: f32[1,256], index: 1, kind: input, shape index: {}]   ;;  %s353_s2 = inlined_call_operand.hbm [shape: f32[8,256], index: 2, kind: input, shape index: {}]   ;;  %s354_s3 = inlined_call_operand.hbm [shape: f32[8,256], index: 3, kind: output, shape index: {}]  }
   0x1   :  { %9 = vsyncpa [#allocation6], 0  ;;  %s27_s14 = sshll.u32 %s352_s1, 4  ;;  %s28_s14 = int_to_ptr.hbm [resolvable:$true] %s27_s14 }
   0x2   :  { %10 = vsyncpa [#allocation4], 0  ;;  %s281_s15 = smov [#allocation5]   ;;  %s16_s19 = sshll.u32 %s351_s0, 4  ;;  %s17_s19 = int_to_ptr.hbm [resolvable:$true] %s16_s19 }
   0x3   :  { %s29_s16 = sshll.u32 %s281_s15, 4  ;;  %s282_s20 = smov [#allocation2]   ;;  %s30_s16 = int_to_ptr.vmem [resolvable:$true] %s29_s16 }
   0x4   :  { %32 = dma.hbm_to_vmem [thread:$0]  %s28_s14, 32, %s30_s16, [#allocation6]  }
   0x5   :  { %s18_s21 = sshll.u32 %s282_s20, 4  ;;  %s38_s24 = sshll.u32 %s353_s2, 4  ;;  %s19_s21 = int_to_ptr.vmem [resolvable:$true] %s18_s21  ;;  %s39_s24 = int_to_ptr.hbm [resolvable:$true] %s38_s24 }
   0x6   :  { %21 = dma.hbm_to_vmem [thread:$0]  %s17_s19, 32, %s19_s21, [#allocation3]  }
   0x7   :  { %s283_s1 = smov [#allocation7]  }
   0x8   :  { %s40_s25 = sshll.u32 %s283_s1, 4  ;;  %s41_s25 = int_to_ptr.vmem [resolvable:$true] %s40_s25 }
   0x9   :  { %43 = dma.hbm_to_vmem [thread:$0]  %s39_s24, 256, %s41_s25, [#allocation6]  }
   0xa   :  { %275 = dma.done.wait [#allocation3], 32  }
   0xb   :  { %276 = vsyncadd [#allocation3], 4294967264 }
   0xc   :  { %277 = dma.done.wait [#allocation6], 288  }
   0xd   :  { %278 = vsyncadd [#allocation6], 4294967008  ;;  %v56_v0 = vld [vmem:[#allocation7] sm:$0xff]  ;;  %s284_s0 = smov 1   ;;  %s285_s26 = smov 127   ;;  %v57_v1 = vld [vmem:[#allocation7 + $0x8] sm:$0xff]  ;;  %v64_v2 = vlaneseq }
   0xe   :  { %76 = vrot.lane.b32.xlu1 %v56_v0, %s284_s0  ;;  %60 = vrot.lane.b32.xlu0 %v56_v0, %s285_s26  ;;  %v59_v5 = vld [vmem:[#allocation5] sm:$0x3]  ;;  %v58_v7 = vld [vmem:[#allocation2] sm:$0x3]  ;;  %v92_v22 = vmul.f32 2.0, %v56_v0  ;;  %v93_v23 = vmul.f32 2.0, %v57_v1 }
   0xf   :  { %v318_v6 = vand.u32 127, %v64_v2  ;;  %v84_v8 = vperm.slane %v59_v5, 0  ;;  %v85_v9 = vperm.slane %v59_v5, 1  ;;  %v70_v10 = vperm.slane %v58_v7, 0  ;;  %s286_s2 = smov 112   ;;  %s287_s27 = smov 16  }
  0x10   :  { %v71_v11 = vperm.slane %v58_v7, 1  ;;  %s288_s28 = smov [#allocation8]   ;;  %s160_s5 = sshll.u32 %s354_s3, 4  ;;  %s161_s5 = int_to_ptr.hbm [resolvable:$true] %s160_s5 }
  0x11   :  { %vm80_vm0 = vcmp.lt.s32.totalorder %v318_v6, 1  ;;  %vm66_vm1 = vcmp.lt.s32.totalorder %v318_v6, 127  ;;  %vm107_vm2 = vcmp.lt.s32.totalorder %v318_v6, 16  ;;  %v98_v33 = vadd.s32 128, %v318_v6  ;;  %s158_s29 = sshll.u32 %s288_s28, 4  ;;  %s159_s29 = int_to_ptr.vmem [resolvable:$true] %s158_s29 }
  0x12   :  { %vm116_vm3 = vcmp.lt.s32.totalorder %v318_v6, 112  ;;  %vm99_vm4 = vcmp.ge.s32.totalorder %v318_v6, 16 }
  0x13   :  { %vm102_vm5 = vcmp.lt.s32.totalorder %v98_v33, 240 }
  0x16   :  { %78 = vrot.lane.b32.xlu1 %v57_v1, %s284_s0  ;;  %62 = vrot.lane.b32.xlu0 %v57_v1, %s285_s26 }
  0x80   :  { %v77_v3 = vpop.permute.xlu1 %76  ;;  %v61_v4 = vpop.permute.xlu0 %60 }
  0x88   :  { %v79_v12 = vpop.permute.xlu1 %78  ;;  %v63_v13 = vpop.permute.xlu0 %62 }
  0x89   :  { %v81_v14 = vsel %vm80_vm0, %v77_v3, %v79_v12  ;;  %v82_v15 = vsel %vm80_vm0, %v79_v12, %v77_v3  ;;  %v67_v16 = vsel %vm66_vm1, %v61_v4, %v63_v13  ;;  %v68_v17 = vsel %vm66_vm1, %v63_v13, %v61_v4 }
  0x8a   :  { %v88_v18 = vmul.f32 %v84_v8, %v82_v15  ;;  %v89_v19 = vmul.f32 %v85_v9, %v81_v14  ;;  %v74_v20 = vmul.f32 %v70_v10, %v67_v16  ;;  %v75_v21 = vmul.f32 %v71_v11, %v68_v17 }
  0x8c   :  { %v91_v24 = vsub.f32 %v75_v21, %v89_v19  ;;  %v90_v25 = vsub.f32 %v74_v20, %v88_v18  ;;  %v94_v26 = vadd.f32 %v92_v22, %v88_v18  ;;  %v95_v27 = vadd.f32 %v93_v23, %v89_v19 }
  0x8e   :  { %114 = vrot.lane.b32.xlu1 %v91_v24, %s286_s2  ;;  %112 = vrot.lane.b32.xlu0 %v90_v25, %s286_s2  ;;  %v97_v28 = vadd.f32 %v95_v27, %v75_v21  ;;  %v96_v29 = vadd.f32 %v94_v26, %v74_v20  ;;  %v138_v40 = vmul.f32 2.0, %v91_v24  ;;  %v137_v41 = vmul.f32 2.0, %v90_v25 }
  0x8f   :  { %103 = vrot.lane.b32.xlu2 %v90_v25, %s287_s27 }
  0x96   :  { %123 = vrot.lane.b32.xlu0 %v97_v28, %s287_s27  ;;  %129 = vrot.lane.b32.xlu1 %v96_v29, %s286_s2 }
  0x97   :  { %105 = vrot.lane.b32.xlu2 %v91_v24, %s287_s27 }
  0x9f   :  { %121 = vrot.lane.b32.xlu2 %v96_v29, %s287_s27 }
  0xa7   :  { %131 = vrot.lane.b32.xlu2 %v97_v28, %s286_s2 }
  0xe9   :  { %v104_v30 = vpop.permute.xlu2 %103 }
  0xf1   :  { %v106_v31 = vpop.permute.xlu2 %105 }
  0xf2   :  { %v109_v34 = vsel %vm107_vm2, %v106_v31, %v104_v30  ;;  %v108_v38 = vsel %vm107_vm2, %v104_v30, %v106_v31 }
  0xf3   :  { %v110_v39 = vsel %vm99_vm4, %v109_v34, 0.0  ;;  %v140_v45 = vadd.f32 %v138_v40, %v108_v38 }
  0xf4   :  { %v139_v44 = vadd.f32 %v137_v41, %v110_v39 }
  0xf9   :  { %v122_v32 = vpop.permute.xlu2 %121 }
 0x100   :  { %v115_v35 = vpop.permute.xlu1 %114  ;;  %v113_v36 = vpop.permute.xlu0 %112 }
 0x101   :  { %v118_v37 = vsel %vm116_vm3, %v115_v35, %v113_v36  ;;  %v117_v42 = vsel %vm116_vm3, %v113_v36, %v115_v35  ;;  %v132_v46 = vpop.permute.xlu2 %131 }
 0x102   :  { %v120_v43 = vsel %vm102_vm5, %v118_v37, 0.0  ;;  %v141_v47 = vadd.f32 %v139_v44, %v117_v42 }
 0x103   :  { %v142_v48 = vadd.f32 %v140_v45, %v120_v43 }
 0x104   :  { %v145_v59 = vand.u32 2147483647, %v141_v47 }
 0x105   :  { %v146_v60 = vand.u32 2147483647, %v142_v48 }
 0x108   :  { %v124_v49 = vpop.permute.xlu0 %123  ;;  %v130_v50 = vpop.permute.xlu1 %129 }
 0x109   :  { %v125_v51 = vsel %vm107_vm2, %v122_v32, %v124_v49  ;;  %v126_v52 = vsel %vm107_vm2, %v124_v49, %v122_v32  ;;  %v133_v53 = vsel %vm116_vm3, %v130_v50, %v132_v46  ;;  %v134_v54 = vsel %vm116_vm3, %v132_v46, %v130_v50 }
 0x10a   :  { %v127_v55 = vsel %vm99_vm4, %v126_v52, 0.0  ;;  %v136_v56 = vsel %vm102_vm5, %v134_v54, 0.0 }
 0x10b   :  { %v143_v57 = vsub.f32 %v127_v55, %v133_v53  ;;  %v144_v58 = vsub.f32 %v125_v51, %v136_v56 }
 0x10d   :  { %v147_v61 = vand.u32 2147483647, %v143_v57  ;;  %v148_v62 = vand.u32 2147483647, %v144_v58 }
 0x10f   :  { %v149_v63 = vadd.f32 %v147_v61, %v145_v59  ;;  %v150_v0 = vadd.f32 %v148_v62, %v146_v60 }
 0x111   :  { %151 = vst [vmem:[#allocation8] sm:$0xff] %v149_v63 }
 0x112   :  { %152 = vst [vmem:[#allocation8 + $0x8] sm:$0xff] %v150_v0 }
 0x113   :  { %163 = dma.vmem_to_hbm [thread:$0]  %s159_s29, 256, %s161_s5, [#allocation4]  }
 0x114   :  { %279 = dma.done.wait [#allocation4], 256  }
 0x115   :  { %280 = vsyncadd [#allocation4], 4294967040 }
 0x116   :  { %168 = vsyncpa [#allocation3], 1 }
 0x117   :  { %169 = vsyncpa [#allocation6], 1 }
 0x118   :  { %170 = vsyncpa [#allocation4], 1 }

</bundles_post_ra>
